<compile_context>
chip_gen: v7x
topology: tpu7x:2x2x1
jax: 0.10.0
libtpu: 0.0.40
codegen_flags: <defaults>
</compile_context>

<pallas_src>
import jax
import jax.numpy as jnp
from jax.experimental import pallas as pl
from jax.experimental.pallas import tpu as pltpu


def _attack_kernel(consts_ref, x_ref, sign_ref, o_ref):
    """Fused denorm -> FGSM attack -> renorm on one (BN, BP) tile.

    consts_ref: SMEM (3, C) f32 rows = [eps/std, -mean/std, (1-mean)/std]
    x_ref/o_ref: VMEM (BN, BP) tiles of the (padded) image data.
    sign_ref:    VMEM (BN, BP) int8 perturbation sign (+/-1).
    """
    c = pl.program_id(1)              # channel owning this tile
    scale = consts_ref[0, c]          # eps / std_c
    lo = consts_ref[1, c]             # (0 - mean_c) / std_c
    hi = consts_ref[2, c]             # (1 - mean_c) / std_c

    x = x_ref[...].astype(jnp.float32)
    s = sign_ref[...].astype(jnp.float32)
    o_ref[...] = jnp.clip(x + s * scale, lo, hi).astype(o_ref.dtype)


def _pick_block(dim, unit, target):
    """Largest multiple of `unit` that divides `dim` and is <= target, else full dim."""
    best = None
    b = unit
    limit = min(dim, max(target, unit))
    while b <= limit:
        if dim % b == 0:
            best = b
        b += unit
    return best if best is not None else dim


def denormalized_attack_wrapper(x, mean, std, sign, eps,
                                *, block_batch=256, block_pixels=1024):
    """out = normalize(clip(denormalize(x) + eps*sign, 0, 1)).  Assumes std > 0."""
    N, C, H, W = x.shape
    HW = H * W
    HW_pad = ((HW + 127) // 128) * 128          # lane-dense tiles

    x3 = x.reshape(N, C, HW)
    s3 = sign.reshape(N, C, HW)
    if HW_pad != HW:
        pad = ((0, 0), (0, 0), (0, HW_pad - HW))
        x3 = jnp.pad(x3, pad)
        s3 = jnp.pad(s3, pad)
    x2 = x3.reshape(N, C * HW_pad)
    s2 = s3.reshape(N, C * HW_pad)

    mean = jnp.asarray(mean, jnp.float32).reshape(C)
    std = jnp.asarray(std, jnp.float32).reshape(C)
    # Per-channel constants of the fused affine+clip rewrite (exact for std > 0).
    consts = jnp.stack([eps / std, (0.0 - mean) / std, (1.0 - mean) / std])  # (3, C)

    BN = _pick_block(N, unit=32, target=block_batch)        # 32: int8 sublane packing
    BP = _pick_block(HW_pad, unit=128, target=block_pixels)  # multiple of 128 lanes
    n_pix_blocks = HW_pad // BP

    def idx_map(i, c, j, consts_ref):   # consts_ref: scalar-prefetch ref (unused here)
        return (i, c * n_pix_blocks + j)

    out2 = pl.pallas_call(
        _attack_kernel,
        out_shape=jax.ShapeDtypeStruct((N, C * HW_pad), x.dtype),
        grid_spec=pltpu.PrefetchScalarGridSpec(
            num_scalar_prefetch=1,
            grid=(N // BN, C, n_pix_blocks),
            in_specs=[
                pl.BlockSpec((BN, BP), idx_map),   # x (f32)
                pl.BlockSpec((BN, BP), idx_map),   # sign (int8)
            ],
            out_specs=pl.BlockSpec((BN, BP), idx_map),
        ),
        compiler_params=pltpu.CompilerParams(
            dimension_semantics=("parallel", "parallel", "parallel")),
    )(consts, x2, s2)

    return out2.reshape(N, C, HW_pad)[:, :, :HW].reshape(N, C, H, W)


def _reference(x, mean, std, sign, eps):
    m = jnp.asarray(mean, jnp.float32).reshape(1, -1, 1, 1)
    s = jnp.asarray(std, jnp.float32).reshape(1, -1, 1, 1)
    px = x * s + m                                   # denormalize_img
    adv = jnp.clip(px + eps * sign.astype(x.dtype), 0.0, 1.0)   # attack
    return (adv - m) / s                             # normalize_img


if __name__ == "__main__":
    key = jax.random.PRNGKey(0)
    eps = 8.0 / 255.0

    # (N, C, H, W, block_batch, block_pixels) -- exercises pixel tiling,
    # non-multiple-of-128 spatial padding, and batch tiling respectively.
    configs = [
        (2, 4, 16, 16, 256, 128),
        (2, 3, 24, 24, 256, 1024),
        (64, 3, 16, 16, 32, 256),
    ]

    for cfg_idx, (N, C, H, W, bb, bp) in enumerate(configs):
        k_x, k_p, key = jax.random.split(key, 3)
        x = jax.random.normal(k_x, (N, C, H, W), dtype=jnp.float32)
        mean = jnp.linspace(0.4, 0.5, C).astype(jnp.float32)
        std = jnp.linspace(0.2, 0.3, C).astype(jnp.float32)
        sign = jnp.sign(jax.random.normal(k_p, (N, C, H, W))).astype(jnp.int8)

        out = denormalized_attack_wrapper(x, mean, std, sign, eps,
                                          block_batch=bb, block_pixels=bp)
        out = jax.block_until_ready(out)

        ref = _reference(x, mean, std, sign, eps)
        assert out.shape == x.shape and out.dtype == x.dtype
        assert jnp.allclose(out, ref, atol=2e-5, rtol=2e-5), \
            f"mismatch vs reference in config {cfg_idx}"

    print("KERNEL_OK")
</pallas_src>

<mosaic_0001>
module attributes {stable_mosaic.version = 11 : i64} {
  func.func @_attack_kernel(%arg0: i32, %arg1: i32, %arg2: i32, %arg3: memref<3x4xf32, #tpu.memory_space<smem>>, %arg4: memref<2x128xf32, #tpu.memory_space<vmem>>, %arg5: memref<2x128xi8, #tpu.memory_space<vmem>>, %arg6: memref<2x128xf32, #tpu.memory_space<vmem>>) attributes {dimension_semantics = [#tpu.dimension_semantics<parallel>, #tpu.dimension_semantics<parallel>, #tpu.dimension_semantics<parallel>], iteration_bounds = array<i64: 1, 4, 2>, scalar_prefetch = 1 : i64, scratch_operands = 0 : i64, tpu.core_type = #tpu.core_type<tc>, window_params = [{transform_indices = @transform_0, window_bounds = array<i64: 2, 128>}, {transform_indices = @transform_1, window_bounds = array<i64: 2, 128>}, {transform_indices = @transform_2, window_bounds = array<i64: 2, 128>}]} {
    %c0 = arith.constant 0 : index
    %0 = arith.index_cast %arg1 : i32 to index
    %1 = memref.load %arg3[%c0, %0] : memref<3x4xf32, #tpu.memory_space<smem>>
    %c1 = arith.constant 1 : index
    %2 = arith.index_cast %arg1 : i32 to index
    %3 = memref.load %arg3[%c1, %2] : memref<3x4xf32, #tpu.memory_space<smem>>
    %c2 = arith.constant 2 : index
    %4 = arith.index_cast %arg1 : i32 to index
    %5 = memref.load %arg3[%c2, %4] : memref<3x4xf32, #tpu.memory_space<smem>>
    %c0_0 = arith.constant 0 : index
    %c0_1 = arith.constant 0 : index
    %6 = vector.load %arg4[%c0_0, %c0_1] : memref<2x128xf32, #tpu.memory_space<vmem>>, vector<2x128xf32>
    %c0_2 = arith.constant 0 : index
    %c0_3 = arith.constant 0 : index
    %7 = vector.load %arg5[%c0_2, %c0_3] : memref<2x128xi8, #tpu.memory_space<vmem>>, vector<2x128xi8>
    %8 = arith.sitofp %7 : vector<2x128xi8> to vector<2x128xf32>
    %9 = vector.broadcast %1 : f32 to vector<2x128xf32>
    %10 = arith.mulf %8, %9 : vector<2x128xf32>
    %11 = arith.addf %6, %10 : vector<2x128xf32>
    %12 = vector.broadcast %3 : f32 to vector<2x128xf32>
    %13 = arith.maximumf %12, %11 : vector<2x128xf32>
    %14 = vector.broadcast %5 : f32 to vector<2x128xf32>
    %15 = arith.minimumf %14, %13 : vector<2x128xf32>
    %c0_4 = arith.constant 0 : index
    %c0_5 = arith.constant 0 : index
    %16 = vector.load %arg6[%c0_4, %c0_5] : memref<2x128xf32, #tpu.memory_space<vmem>>, vector<2x128xf32>
    tpu.vector_store %arg6[%c0_4, %c0_5], %15 {strides = array<i32>} : memref<2x128xf32, #tpu.memory_space<vmem>>, vector<2x128xf32>,
    return
  }
  func.func @transform_0(%arg0: i32, %arg1: i32, %arg2: i32, %arg3: memref<3x4xf32, #tpu.memory_space<smem>>) -> (i32, i32) {
    %c2_i32 = arith.constant 2 : i32
    %0 = arith.muli %arg1, %c2_i32 : i32
    %1 = arith.addi %0, %arg2 : i32
    %c0_i32 = arith.constant 0 : i32
    return %arg0, %1 : i32, i32
  }
  func.func @transform_1(%arg0: i32, %arg1: i32, %arg2: i32, %arg3: memref<3x4xf32, #tpu.memory_space<smem>>) -> (i32, i32) {
    %c2_i32 = arith.constant 2 : i32
    %0 = arith.muli %arg1, %c2_i32 : i32
    %1 = arith.addi %0, %arg2 : i32
    %c0_i32 = arith.constant 0 : i32
    return %arg0, %1 : i32, i32
  }
  func.func @transform_2(%arg0: i32, %arg1: i32, %arg2: i32, %arg3: memref<3x4xf32, #tpu.memory_space<smem>>) -> (i32, i32) {
    %c2_i32 = arith.constant 2 : i32
    %0 = arith.muli %arg1, %c2_i32 : i32
    %1 = arith.addi %0, %arg2 : i32
    %c0_i32 = arith.constant 0 : i32
    return %arg0, %1 : i32, i32
  }
}

</mosaic_0001>

<bundles_post_ra>
// kernel: tpu_custom_call.1
= control target key start
LH: loop header
LB: loop body
LE: loop exit
PB: predicated region body
PF: predicated region fallthrough
CT: control target
= control target key end

     0   :  { %s975_s0 = inlined_call_operand.hbm [shape: f32[3,4], index: 0, kind: input, shape index: {}]   ;;  %s976_s1 = inlined_call_operand.hbm [shape: f32[2,1024], index: 1, kind: input, shape index: {}]   ;;  %s977_s2 = inlined_call_operand.hbm [shape: s8[2,1024], index: 2, kind: input, shape index: {}]   ;;  %s978_s3 = inlined_call_operand.hbm [shape: f32[2,1024], index: 3, kind: output, shape index: {}]  }
   0x1   :  { %981 = sst [smem:[#allocation14_spill]] %s976_s1  ;;  %s521_s14 = scalar_lea.hbm %s975_s0, 64 }
   0x2   :  { %982 = sst [smem:[#allocation15_spill]] %s977_s2  ;;  %p522_p0 = scmp.ne.s32.totalorder %s975_s0, %s521_s14 }
   0x3   :  { %p525_p1 = scmp.lt.u32.totalorder %s521_s14, %s975_s0 }
   0x5   :  { %p527_p2 = pnand %p525_p1, %p522_p0 }
   0x7   :  { %530 = shalt.err (!%p527_p2)  }
   0x8   :  { %s697_s19 = smov [#allocation3]  }
   0x9   :  { %9 = dma.hbm_to_smem %s975_s0, 64, %s697_s19, [#allocation2] }
   0xa   :  { %651 = dma.done.wait [#allocation2], 64 }
   0xb   :  { %652 = vsyncadd [#allocation2], 4294967232 }
   0xc   :  { %11 = sfence }
   0xd   :  { %12 = vsyncpa [#allocation5], 0 }
   0xe   :  { %14 = vsyncpa [#allocation5 + $0x1], 0 }
   0xf   :  { %15 = vsyncpa [#allocation8], 0 }
  0x10   :  { %17 = vsyncpa [#allocation8 + $0x1], 0 }
  0x11   :  { %18 = vsyncpa [#allocation6], 0 }
  0x12   :  { %20 = vsyncpa [#allocation6 + $0x1], 0  ;;  %s733_s22 = smov 0   ;;  %s735_s23 = smov 0  }
  0x13   :  { %s737_s24 = smov 0   ;;  %s739_s25 = smov 0  }
  0x14   :  { %s741_s26 = smov 0   ;;  %s743_s0 = smov 0  }
  0x15   :  { %s745_s27 = smov 0   ;;  %s747_s28 = smov 0  }
  0x16 LB: > { %s408_s29 = sadd.s32 4294967295, %s695_s28   ;;  %s409_s30 = sadd.s32 4294967294, %s695_s28   ;;  %s695_s28 = sphi %s747_s28, %s26_s28   ;;  %s691_s27 = sphi %s745_s27, %s1003_s27   ;;  %s687_s0 = sphi %s743_s0, %s1002_s0   ;;  %s683_s26 = sphi %s741_s26, %s1001_s26   ;;  %s679_s25 = sphi %s739_s25, %s1000_s25   ;;  %s675_s24 = sphi %s737_s24, %s999_s24   ;;  %s671_s23 = sphi %s735_s23, %s998_s23   ;;  %s667_s22 = sphi %s733_s22, %s997_s22  }
  0x17   : > { %s38_s4 = sadd.s32 1, %s687_s0  ;;  %s41_s5 = sadd.s32 1, %s691_s27 }
  0x18   : > { %p39_p3 = scmp.ge.s32.totalorder %s38_s4, 2  ;;  %s410_s6 = sshll.u32 %s691_s27, 1 }
  0x19   : > { %s779_s7 = sadd.s32 %s687_s0, %s410_s6  ;;  %s58_s8 = sadd.s32 1, %s675_s24 }
  0x1a   : > { %s1005_s4 = smov (%p39_p3, %s38_s4), 0  ;;  %s1007_s5 = smov (!%p39_p3, %s41_s5), %s691_s27 }
  0x1b   : > { %p65_p4 = scmp.ne.s32.totalorder %s675_s24, %s671_s23  ;;  %p66_p5 = scmp.eq.s32.totalorder %s695_s28, 0 }
  0x1c   : > { %p43_p6 = scmp.ge.s32.totalorder %s1007_s5, 4  ;;  %p71_p7 = scmp.ne.s32.totalorder %s671_s23, %s667_s22 }
  0x1d   : > { %p790_p8 = por %p66_p5, %p65_p4  ;;  %p72_p9 = scmp.eq.s32.totalorder %s408_s29, 0 }
  0x1e   : > { %s1009_s5 = smov (%p43_p6, %s1007_s5), 0  ;;  %p133_p11 = scmp.eq.s32.totalorder %s408_s29, 7 }
  0x1f   : > { %p796_p10 = por %p72_p9, %p71_p7  ;;  %s411_s11 = sshll.u32 %s1009_s5, 1 }
  0x20   : > { %p139_p12 = scmp.eq.s32.totalorder %s409_s30, 7  ;;  %s52_s12 = sadd.s32 %s411_s11, %s1005_s4 }
  0x21   : > { %s984_s10 = scalar_select %p796_p10, 1, 0 }
  0x22   : > { %p802_p13 = por %p133_p11, %p65_p4  ;;  %s54_s14 = ssub.s32 %s779_s7, %s52_s12 }
  0x23   : > { %p807_p0 = por %p139_p12, %p71_p7  ;;  %p56_p1 = scmp.eq.s32.totalorder %s54_s14, 0 }
  0x24   : > { %s985_s13 = scalar_select %p802_p13, 1, 0 }
  0x25   : > { %s986_s15 = scalar_select %p807_p0, 1, 0 }
  0x26   : > { %p454_p2 = scmp.lt.s32.totalorder %s695_s28, 8  ;;  %s813_s16 = sand.u32 1, %s675_s24  }
  0x27   : > { %s816_s17 = scalar_select %p56_p1, %s675_s24, %s58_s8  }
  0x28   : > { %s418_s18 = sshll.u32 %s813_s16, 1  ;;  %s420_s19 = sshll.u32 %s779_s7, 5 }
  0x29   : > { %s987_s1 = sld [smem:[#allocation14_spill]]  ;;  %s163_s30 = scalar_lea.vmem [#allocation4], %s418_s18 }
  0x2a   : > { %s174_s6 = sshll.u32 %s163_s30, 4  ;;  %p829_p3 = pnand %p454_p2, %p790_p8  ;;  %s825_s6 = int_to_ptr.vmem [resolvable:$true] %s174_s6 }
  0x2b   : > { %s160_s8 = scalar_lea.sflag [#allocation5], %s813_s16 }
  0x2c   : > { %p533_p7 = pneg %p829_p3 }
  0x2f   : > { %s823_s29 = scalar_lea.hbm %s987_s1, %s420_s19  ;;  %s536_s9 = scalar_lea.hbm %s987_s1, 256 }
  0x30   : > { %s531_s12 = scalar_lea.hbm %s823_s29, 32  ;;  %p537_p8 = scmp.lt.u32.totalorder %s823_s29, %s987_s1 }
  0x31   : > { %p532_p6 = scmp.ne.s32.totalorder %s823_s29, %s531_s12  ;;  %p538_p12 = scmp.lt.u32.totalorder %s536_s9, %s531_s12 }
  0x32   : > { %p540_p2 = scmp.lt.u32.totalorder %s531_s12, %s823_s29 }
  0x33   : > { %p534_p9 = pnand %p533_p7, %p532_p6  ;;  %p539_p1 = por %p538_p12, %p537_p8 }
  0x35   : > { %p535_p11 = pneg %p534_p9  ;;  %p541_p4 = por %p540_p2, %p539_p1 }
  0x37   : > { %p542_p5 = pnand %p541_p4, %p535_p11 }
  0x39   : > { %545 = shalt.err (!%p542_p5)
}
  0x3a   : > { %s546_s21 = scalar_lea.vmem %s825_s6, 32  ;;  %s698_s30 = smov [#allocation4]  }
  0x3b   : > { %p547_p6 = scmp.ne.s32.totalorder %s825_s6, %s546_s21  ;;  %s551_s14 = sshll.u32 %s698_s30, 4  ;;  %s552_s14 = int_to_ptr.vmem [resolvable:$false] %s551_s14 }
  0x3c   : > { %s553_s18 = scalar_lea.vmem %s552_s14, 64  ;;  %p554_p13 = scmp.lt.s32.totalorder %s825_s6, %s552_s14 }
  0x3d   : > { %p549_p9 = pnand %p547_p6, %p533_p7  ;;  %p555_p8 = scmp.lt.s32.totalorder %s553_s18, %s546_s21 }
  0x3f   : > { %p550_p0 = pneg %p549_p9  ;;  %p556_p12 = por %p555_p8, %p554_p13 }
  0x41   : > { %p557_p1 = pnand %p556_p12, %p550_p0 }
  0x43   : > { %560 = shalt.err (!%p557_p1)
}
  0x44   : > { %446 = dma.hbm_to_vmem [thread:$0]  (!%p829_p3), %s823_s29, 32, %s825_s6, %s160_s8  }
  0x45   : > { %p989_p4 = scmp.lt.s32.totalorder %s695_s28, 9  ;;  %p990_p5 = scmp.ge.s32.totalorder %s695_s28, 1 }
  0x46   : > { %s422_s9 = sshll.u32 %s779_s7, 4  ;;  %s184_s19 = scalar_lea.vmem [#allocation7], %s813_s16 }
  0x47   : > { %p865_p11 = pnand %p990_p5, %p989_p4  ;;  %s195_s20 = sshll.u32 %s184_s19, 4  ;;  %s196_s20 = int_to_ptr.vmem [resolvable:$true] %s195_s20 }
  0x48   : > { %s992_s2 = sld [smem:[#allocation15_spill]]  ;;  %s182_s29 = scalar_lea.sflag [#allocation8], %s813_s16 }
  0x49   : > { %s991_s12 = scalar_select %p865_p11, 1, 0 }
  0x4e   : > { %s874_s14 = scalar_lea.hbm %s992_s2, %s422_s9  ;;  %s566_s18 = scalar_lea.hbm %s992_s2, 128 }
  0x4f   : > { %s561_s6 = scalar_lea.hbm %s874_s14, 16  ;;  %p567_p6 = scmp.lt.u32.totalorder %s874_s14, %s992_s2 }
  0x50   : > { %p562_p13 = scmp.ne.s32.totalorder %s874_s14, %s561_s6  ;;  %p568_p9 = scmp.lt.u32.totalorder %s566_s18, %s561_s6 }
  0x51   : > { %p570_p12 = scmp.lt.u32.totalorder %s561_s6, %s874_s14 }
  0x52   : > { %p564_p0 = pnand %p562_p13, %p533_p7  ;;  %p569_p8 = por %p568_p9, %p567_p6 }
  0x54   : > { %p565_p2 = pneg %p564_p0  ;;  %p571_p1 = por %p570_p12, %p569_p8 }
  0x56   : > { %p572_p4 = pnand %p571_p1, %p565_p2 }
  0x58   : > { %575 = shalt.err (!%p572_p4)
}
  0x59   : > { %s576_s16 = scalar_lea.vmem %s196_s20, 16  ;;  %s699_s9 = smov [#allocation7]  }
  0x5a   : > { %p577_p5 = scmp.ne.s32.totalorder %s196_s20, %s576_s16  ;;  %s581_s30 = sshll.u32 %s699_s9, 4  ;;  %s582_s30 = int_to_ptr.vmem [resolvable:$false] %s581_s30 }
  0x5b   : > { %s583_s7 = scalar_lea.vmem %s582_s30, 32  ;;  %p584_p10 = scmp.lt.s32.totalorder %s196_s20, %s582_s30 }
  0x5c   : > { %p579_p13 = pnand %p577_p5, %p533_p7  ;;  %p585_p11 = scmp.lt.s32.totalorder %s583_s7, %s576_s16 }
  0x5e   : > { %p580_p0 = pneg %p579_p13  ;;  %p586_p6 = por %p585_p11, %p584_p10 }
  0x60   : > { %p587_p9 = pnand %p586_p6, %p580_p0 }
  0x62   : > { %590 = shalt.err (!%p587_p9)
}
  0x63   : > { %449 = dma.hbm_to_vmem [thread:$0]  (!%p829_p3), %s874_s14, 16, %s196_s20, %s182_s29  }
  0x64   : > { %p993_p2 = scmp.ne.s32.totalorder %s991_s12, 0 }
  0x65   : > { %s899_s6 = sand.u32 (!%p993_p2), 1, %s671_s23   ;;  %p994_p7 = scmp.ne.s32.totalorder (!%p993_p2), %s984_s10, 0 }
  0x66   : > { %204 = sbr.rel (%p993_p2) target bundleno = 145 (0x91), region = 28  ;;  %s424_s8 = sshll.u32 (!%p993_p2), %s899_s6, 1 }
  0x67   : > { %s207_s18 = scalar_lea.sflag (!%p993_p2), [#allocation5], %s899_s6  ;;  %s210_s19 = scalar_lea.vmem (!%p993_p2), [#allocation4], %s424_s8 }
  0x6d   : > { %654 = dma.done.wait (%p994_p7), %s207_s18, 32  }
  0x6e   : > { %656 = vsyncadd (%p994_p7), %s207_s18, 4294967264  ;;  %s216_s11 = scalar_lea.sflag [#allocation8], %s899_s6  ;;  %s218_s12 = scalar_lea.vmem [#allocation7], %s899_s6 }
  0x6f   : > { %658 = dma.done.wait (%p994_p7), %s216_s11, 16  }
  0x70   : > { %660 = vsyncadd (%p994_p7), %s216_s11, 4294967280  ;;  %s250_s20 = sshra.s32 %s683_s26, 7  ;;  %s249_s14 = sld [smem:[#allocation3 + %s683_s26]]  ;;  %v263_v0 = vld [vmem:[%s218_s12] sm:$0x1] }
  0x71   : > { %s433_s29 = sshll.u32 %s250_s20, 7  ;;  %s255_s16 = sand.u32 127, %s683_s26  ;;  %v264_v1 = vunpack.c.0.s8 %v263_v0  ;;  %v262_v4 = vld [vmem:[%s210_s19] sm:$0x3] }
  0x72   : > { %s434_s21 = sadd.s32 128, %s433_s29  ;;  %s436_s30 = sadd.s32 256, %s433_s29 }
  0x73   : > { %s256_s9 = sadd.s32 %s434_s21, %s255_s16  ;;  %s260_s7 = sadd.s32 %s436_s30, %s255_s16  ;;  %v265_v3 = vcvt.s32.f32 %v264_v1 }
  0x74   : > { %s257_s18 = sld [smem:[#allocation3 + %s256_s9]]  ;;  %s429_s10 = sshll.u32 %s683_s26, 1 }
  0x75   : > { %s261_s1 = sld [smem:[#allocation3 + %s260_s7]]  ;;  %s283_s11 = sadd.s32 %s679_s25, %s429_s10 }
  0x76   : > { %v266_v2 = vstv %s249_s14  ;;  %s242_s20 = scalar_lea.vmem [#allocation9], %s424_s8  ;;  %s430_s21 = sshll.u32 %s283_s11, 5 }
  0x77   : > { %v267_v5 = vmul.f32 %v266_v2, %v265_v3  ;;  %s292_s2 = sshll.u32 %s242_s20, 4  ;;  %s923_s19 = scalar_lea.hbm %s978_s3, %s430_s21  ;;  %s918_s2 = int_to_ptr.vmem [resolvable:$true] %s292_s2 }
  0x78   : > { %s275_s25 = scalar_lea.sflag [#allocation6], %s899_s6  ;;  %s591_s14 = scalar_lea.vmem %s918_s2, 32 }
  0x79   : > { %v268_v7 = vadd.f32 %v267_v5, %v262_v4  ;;  %p592_p10 = scmp.ne.s32.totalorder %s918_s2, %s591_s14  ;;  %p995_p3 = scmp.ne.s32.totalorder %s985_s13, 0 }
  0x7a   : > { %v269_v6 = vstv %s257_s18 }
  0x7b   : > { %v271_v8 = vstv %s261_s1  ;;  %v270_v9 = vmax.f32 %v269_v6, %v268_v7  ;;  %p593_p11 = pnand %p592_p10, %p995_p3  ;;  %s700_s1 = smov [#allocation9]  }
  0x7c   : > { %s595_s8 = sshll.u32 %s700_s1, 4  ;;  %s596_s8 = int_to_ptr.vmem [resolvable:$false] %s595_s8 }
  0x7d   : > { %v272_v10 = vmin.f32 %v271_v8, %v270_v9  ;;  %p594_p8 = pneg %p593_p11  ;;  %s597_s29 = scalar_lea.vmem %s596_s8, 64 }
  0x7e   : > { %p598_p12 = scmp.lt.s32.totalorder %s918_s2, %s596_s8  ;;  %p599_p1 = scmp.lt.s32.totalorder %s597_s29, %s591_s14 }
  0x7f   : > { %273 = vst [vmem:[%s242_s20] sm:$0x3] %v272_v10 }
  0x80   : > { %p600_p4 = por %p599_p1, %p598_p12 }
  0x82   : > { %p601_p5 = pnand %p600_p4, %p594_p8 }
  0x84   : > { %604 = shalt.err (!%p601_p5)
}
  0x85   : > { %s605_s6 = scalar_lea.hbm %s923_s19, 32  ;;  %s609_s30 = scalar_lea.hbm %s978_s3, 256 }
  0x86   : > { %p606_p13 = scmp.ne.s32.totalorder %s923_s19, %s605_s6  ;;  %p610_p9 = scmp.lt.u32.totalorder %s923_s19, %s978_s3 }
  0x87   : > { %p611_p2 = scmp.lt.u32.totalorder %s609_s30, %s605_s6  ;;  %p613_p10 = scmp.lt.u32.totalorder %s605_s6, %s923_s19 }
  0x88   : > { %p607_p0 = pnand %p606_p13, %p995_p3 }
  0x89   : > { %p612_p7 = por %p611_p2, %p610_p9 }
  0x8a   : > { %p608_p6 = pneg %p607_p0 }
  0x8b   : > { %p614_p11 = por %p613_p10, %p612_p7 }
  0x8d   : > { %p615_p8 = pnand %p614_p11, %p608_p6 }
  0x8f   : > { %618 = shalt.err (!%p615_p8)
}
  0x90   : > { %441 = dma.vmem_to_hbm [thread:$0]  (%p995_p3), %s918_s2, 32, %s923_s19, %s275_s25  }
  0x91 PF: > { %p455_p12 = scmp.ge.s32.totalorder %s695_s28, 2  ;;  %s304_s10 = sand.u32 1, %s667_s22  }
  0x92   : > { %p996_p1 = scmp.ne.s32.totalorder %s986_s15, 0  ;;  %s305_s11 = scalar_lea.sflag [#allocation6], %s304_s10 }
  0x94   : > { %p451_p4 = pnand %p455_p12, %p996_p1 }
  0x96   : > { %662 = dma.done.wait (!%p451_p4), %s305_s11, 32  }
  0x97   : > { %664 = vsyncadd (!%p451_p4), %s305_s11, 4294967264  ;;  %s26_s28 = sadd.s32 1, %s695_s28   ;;  %s997_s22 = smov %s671_s23 }
  0x98   : > { %p23_p5 = scmp.ge.s32.totalorder %s26_s28, 10   ;;  %s998_s23 = smov %s675_s24 }
  0x99   : > { %s999_s24 = smov %s816_s17  ;;  %s1000_s25 = smov %s687_s0 }
  0x9a   : > { %s1001_s26 = smov %s691_s27  ;;  %s1002_s0 = smov %s1005_s4 }
  0x9b   : > { %s1003_s27 = smov %s1009_s5  ;;  %25 = sbr.rel (!%p23_p5) target bundleno = 22 (0x16), region = 86 }
  0xa2   :  { %310 = vsyncpa [#allocation5], 1 }
  0xa3   :  { %312 = vsyncpa [#allocation5 + $0x1], 1 }
  0xa4   :  { %313 = vsyncpa [#allocation8], 1 }
  0xa5   :  { %315 = vsyncpa [#allocation8 + $0x1], 1 }
  0xa6   :  { %316 = vsyncpa [#allocation6], 1 }
  0xa7   :  { %318 = vsyncpa [#allocation6 + $0x1], 1 }

</bundles_post_ra>
